<compile_context>
chip_gen: v6e
topology: v6e:2x2x1
jax: 0.10.0
libtpu: 0.0.40
codegen_flags: <defaults>
</compile_context>

<pallas_src>
import functools
import math

import jax
import jax.numpy as jnp
from jax.experimental import pallas as pl
from jax.experimental.pallas import tpu as pltpu


def _get_slopes(heads: int):
    """Exact port of AlibiPositionalBias._get_slopes."""
    def get_slopes_power_of_2(n):
        start = 2 ** (-2 ** (-(math.log2(n) - 3)))
        ratio = start
        return [start * ratio ** i for i in range(n)]

    if math.log2(heads).is_integer():
        return get_slopes_power_of_2(heads)
    closest_power_of_2 = 2 ** math.floor(math.log2(heads))
    return (
        get_slopes_power_of_2(closest_power_of_2)
        + get_slopes_power_of_2(2 * closest_power_of_2)[0::2][: heads - closest_power_of_2]
    )


def _vmem_capacity_bytes() -> int:
    """Best-effort VMEM capacity query; conservative (v7x-safe) fallback."""
    try:
        return int(pltpu.get_tpu_info().vmem_capacity_bytes)
    except Exception:
        return 64 << 20


def _largest_divisor_leq(n: int, cap: int) -> int:
    cap = max(1, min(n, cap))
    for d in range(cap, 0, -1):
        if n % d == 0:
            return d
    return 1


def _choose_blocks(i: int, j: int, total_heads: int, block_budget: int):
    """Pick (hb, ti, tj): widen tj first (lane dim), then ti, then head block."""
    BYTES = 4
    ti_floor = i if i <= 8 else 8

    # 1) Lane dim: full j when it fits a minimal (hb=1, ti=ti_floor) block,
    #    otherwise the largest multiple of 128 that fits.
    tj = j
    if ti_floor * tj * BYTES > block_budget:
        tj = max(128, (block_budget // (ti_floor * BYTES)) // 128 * 128)
        tj = min(tj, j)

    # 2) Sublane dim: full i if it fits, otherwise largest multiple of 8.
    ti_cap = max(1, block_budget // (tj * BYTES))
    ti = i if i <= ti_cap else max(8, (ti_cap // 8) * 8)

    # 3) Head block: divisor of total_heads, <= 8, within remaining budget.
    hb_cap = max(1, block_budget // (ti * tj * BYTES))
    hb = _largest_divisor_leq(total_heads, min(8, hb_cap))
    return hb, ti, tj


def _alibi_kernel(slopes_ref, out_ref, *, i_total, j_total, hb):
    """out_ref: (hb, TI, TJ) block; slopes_ref: (total_heads,) f32 in SMEM."""
    gh = pl.program_id(0)
    gi = pl.program_id(1)
    gj = pl.program_id(2)
    _, TI, TJ = out_ref.shape

    # Global row/col of this tile; i_arange[row] = (j - i) + row ; j_arange[col] = col.
    row = jax.lax.broadcasted_iota(jnp.int32, (TI, TJ), 0) + gi * TI
    col = jax.lax.broadcasted_iota(jnp.int32, (TI, TJ), 1) + gj * TJ
    base = -jnp.abs(col - (row + (j_total - i_total))).astype(jnp.float32)

    # One VPU multiply + one lane-dense store per head in the block.
    # Padded heads (h >= heads) have slope 0.0 -> exact zeros, matching pad_at_dim.
    for hh in range(hb):
        out_ref[hh, :, :] = base * slopes_ref[gh * hb + hh]


def alibi_positional_bias(i: int, j: int, heads: int, total_heads: int,
                          *, block_budget_bytes: int | None = None) -> jax.Array:
    """Returns float32 bias of shape (total_heads, i, j)."""
    # Slopes for the first `heads` heads; remaining heads get slope 0 (zero padding).
    slopes = jnp.array(
        _get_slopes(heads) + [0.0] * (total_heads - heads), dtype=jnp.float32
    )

    # Per-generation block budget: v7x (64 MiB VMEM) -> ~16 MiB blocks,
    # v5e/v6e (128 MiB VMEM) -> ~32 MiB blocks.
    vmem_cap = _vmem_capacity_bytes()
    big_vmem = vmem_cap >= (96 << 20)
    if block_budget_bytes is None:
        block_budget_bytes = (32 << 20) if big_vmem else (16 << 20)

    hb, ti, tj = _choose_blocks(i, j, total_heads, block_budget_bytes)
    i_tiles = pl.cdiv(i, ti)
    j_tiles = pl.cdiv(j, tj)
    h_blocks = total_heads // hb

    # Megacore guarantee (v7x): if i/j fit in a single tile, split the head axis
    # so at least two parallel blocks exist.
    if i_tiles * j_tiles * h_blocks == 1 and total_heads > 1:
        hb = _largest_divisor_leq(total_heads, max(1, total_heads // 2))
        h_blocks = total_heads // hb

    grid = (h_blocks, i_tiles, j_tiles)
    block_bytes = hb * ti * tj * 4

    # Double-buffered output block + headroom; capped per generation so a big-VMEM
    # config can never OOM v7x.
    cap_limit = (72 << 20) if big_vmem else (44 << 20)
    vmem_limit = max(32 << 20, min(2 * block_bytes + (8 << 20), cap_limit))

    kernel = functools.partial(_alibi_kernel, i_total=i, j_total=j, hb=hb)

    grid_spec = pltpu.PrefetchScalarGridSpec(
        num_scalar_prefetch=1,                 # slopes live in SMEM
        grid=grid,
        in_specs=[],
        out_specs=pl.BlockSpec(
            (hb, ti, tj),
            lambda gh, gi, gj, slopes: (gh, gi, gj),
        ),
    )

    cost = pl.CostEstimate(
        flops=2 * total_heads * i * j,
        transcendentals=0,
        bytes_accessed=total_heads * i * j * 4 + total_heads * 4,
    )

    return pl.pallas_call(
        kernel,
        out_shape=jax.ShapeDtypeStruct((total_heads, i, j), jnp.float32),
        grid_spec=grid_spec,
        compiler_params=pltpu.CompilerParams(
            dimension_semantics=("parallel", "parallel", "parallel"),
            vmem_limit_bytes=vmem_limit,
        ),
        cost_estimate=cost,
    )(slopes)


def _reference(i: int, j: int, heads: int, total_heads: int) -> jax.Array:
    """Pure-JAX reference mirroring the PyTorch forward."""
    slopes = jnp.array(_get_slopes(heads), dtype=jnp.float32)[:, None, None]
    i_arange = jnp.arange(j - i, j)
    j_arange = jnp.arange(j)
    bias = -jnp.abs(j_arange[None, None, :] - i_arange[None, :, None]).astype(jnp.float32)
    bias = bias * slopes
    return jnp.pad(bias, ((0, total_heads - heads), (0, 0), (0, 0)))


if __name__ == "__main__":
    # PRNGKey kept for convention (forward takes only integer sizes, no tensor inputs).
    _ = jax.random.PRNGKey(0)

    # Small, module-consistent shapes: 6 ALiBi heads out of 8 total, i=8, j=16.
    heads, total_heads = 6, 8
    i, j = 8, 16
    out = jax.block_until_ready(alibi_positional_bias(i, j, heads, total_heads))
    ref = _reference(i, j, heads, total_heads)
    assert out.shape == (total_heads, i, j)
    assert out.dtype == jnp.float32
    assert jnp.allclose(out, ref, atol=1e-6), "mismatch vs reference (full-block path)"

    # Exercise the multi-tile path (tiny block budget forces tj=128 / ti=8 tiling,
    # including partial edge tiles on both i and j) at small size.
    i2, j2 = 20, 200
    out2 = jax.block_until_ready(
        alibi_positional_bias(i2, j2, heads, total_heads, block_budget_bytes=4096)
    )
    ref2 = _reference(i2, j2, heads, total_heads)
    assert out2.shape == (total_heads, i2, j2)
    assert jnp.allclose(out2, ref2, atol=1e-6), "mismatch vs reference (tiled path)"

    print("KERNEL_OK")
</pallas_src>

<mosaic_0001>
module attributes {stable_mosaic.version = 11 : i64} {
  func.func @_alibi_kernel(%arg0: i32, %arg1: i32, %arg2: i32, %arg3: memref<8xf32, #tpu.memory_space<smem>>, %arg4: memref<4x8x16xf32, #tpu.memory_space<vmem>>) attributes {dimension_semantics = [#tpu.dimension_semantics<parallel>, #tpu.dimension_semantics<parallel>, #tpu.dimension_semantics<parallel>], iteration_bounds = array<i64: 2, 1, 1>, scalar_prefetch = 1 : i64, scratch_operands = 0 : i64, tpu.core_type = #tpu.core_type<tc>, window_params = [{transform_indices = @transform_0, window_bounds = array<i64: 4, 8, 16>}]} {
    %0 = tpu.iota {dimensions = array<i32: 0>} : vector<8x16xi32>
    %c8_i32 = arith.constant 8 : i32
    %1 = arith.muli %arg1, %c8_i32 : i32
    %2 = vector.broadcast %1 : i32 to vector<8x16xi32>
    %3 = arith.addi %0, %2 : vector<8x16xi32>
    %4 = tpu.iota {dimensions = array<i32: 1>} : vector<8x16xi32>
    %c16_i32 = arith.constant 16 : i32
    %5 = arith.muli %arg2, %c16_i32 : i32
    %6 = vector.broadcast %5 : i32 to vector<8x16xi32>
    %7 = arith.addi %4, %6 : vector<8x16xi32>
    %c8_i32_0 = arith.constant 8 : i32
    %8 = vector.broadcast %c8_i32_0 : i32 to vector<8x16xi32>
    %9 = arith.addi %3, %8 : vector<8x16xi32>
    %10 = arith.subi %7, %9 : vector<8x16xi32>
    %11 = math.absi %10 : vector<8x16xi32>
    %12 = arith.sitofp %11 : vector<8x16xi32> to vector<8x16xf32>
    %cst = arith.constant 0.000000e+00 : f32
    %13 = vector.broadcast %cst : f32 to vector<8x16xf32>
    %14 = arith.subf %13, %12 : vector<8x16xf32>
    %c4_i32 = arith.constant 4 : i32
    %15 = arith.muli %arg0, %c4_i32 : i32
    %c0_i32 = arith.constant 0 : i32
    %16 = arith.addi %15, %c0_i32 : i32
    %17 = arith.index_cast %16 : i32 to index
    %18 = memref.load %arg3[%17] : memref<8xf32, #tpu.memory_space<smem>>
    %19 = vector.broadcast %18 : f32 to vector<8x16xf32>
    %20 = arith.mulf %14, %19 : vector<8x16xf32>
    %c0 = arith.constant 0 : index
    %c0_1 = arith.constant 0 : index
    %c0_2 = arith.constant 0 : index
    %21 = vector.load %arg4[%c0, %c0_1, %c0_2] : memref<4x8x16xf32, #tpu.memory_space<vmem>>, vector<1x8x16xf32>
    %22 = vector.shape_cast %21 : vector<1x8x16xf32> to vector<8x16xf32>
    %23 = vector.shape_cast %20 : vector<8x16xf32> to vector<1x8x16xf32>
    tpu.vector_store %arg4[%c0, %c0_1, %c0_2], %23 {strides = array<i32>} : memref<4x8x16xf32, #tpu.memory_space<vmem>>, vector<1x8x16xf32>,
    %c4_i32_3 = arith.constant 4 : i32
    %24 = arith.muli %arg0, %c4_i32_3 : i32
    %c1_i32 = arith.constant 1 : i32
    %25 = arith.addi %24, %c1_i32 : i32
    %26 = arith.index_cast %25 : i32 to index
    %27 = memref.load %arg3[%26] : memref<8xf32, #tpu.memory_space<smem>>
    %28 = vector.broadcast %27 : f32 to vector<8x16xf32>
    %29 = arith.mulf %14, %28 : vector<8x16xf32>
    %c1 = arith.constant 1 : index
    %c0_4 = arith.constant 0 : index
    %c0_5 = arith.constant 0 : index
    %30 = vector.load %arg4[%c1, %c0_4, %c0_5] : memref<4x8x16xf32, #tpu.memory_space<vmem>>, vector<1x8x16xf32>
    %31 = vector.shape_cast %30 : vector<1x8x16xf32> to vector<8x16xf32>
    %32 = vector.shape_cast %29 : vector<8x16xf32> to vector<1x8x16xf32>
    tpu.vector_store %arg4[%c1, %c0_4, %c0_5], %32 {strides = array<i32>} : memref<4x8x16xf32, #tpu.memory_space<vmem>>, vector<1x8x16xf32>,
    %c4_i32_6 = arith.constant 4 : i32
    %33 = arith.muli %arg0, %c4_i32_6 : i32
    %c2_i32 = arith.constant 2 : i32
    %34 = arith.addi %33, %c2_i32 : i32
    %35 = arith.index_cast %34 : i32 to index
    %36 = memref.load %arg3[%35] : memref<8xf32, #tpu.memory_space<smem>>
    %37 = vector.broadcast %36 : f32 to vector<8x16xf32>
    %38 = arith.mulf %14, %37 : vector<8x16xf32>
    %c2 = arith.constant 2 : index
    %c0_7 = arith.constant 0 : index
    %c0_8 = arith.constant 0 : index
    %39 = vector.load %arg4[%c2, %c0_7, %c0_8] : memref<4x8x16xf32, #tpu.memory_space<vmem>>, vector<1x8x16xf32>
    %40 = vector.shape_cast %39 : vector<1x8x16xf32> to vector<8x16xf32>
    %41 = vector.shape_cast %38 : vector<8x16xf32> to vector<1x8x16xf32>
    tpu.vector_store %arg4[%c2, %c0_7, %c0_8], %41 {strides = array<i32>} : memref<4x8x16xf32, #tpu.memory_space<vmem>>, vector<1x8x16xf32>,
    %c4_i32_9 = arith.constant 4 : i32
    %42 = arith.muli %arg0, %c4_i32_9 : i32
    %c3_i32 = arith.constant 3 : i32
    %43 = arith.addi %42, %c3_i32 : i32
    %44 = arith.index_cast %43 : i32 to index
    %45 = memref.load %arg3[%44] : memref<8xf32, #tpu.memory_space<smem>>
    %46 = vector.broadcast %45 : f32 to vector<8x16xf32>
    %47 = arith.mulf %14, %46 : vector<8x16xf32>
    %c3 = arith.constant 3 : index
    %c0_10 = arith.constant 0 : index
    %c0_11 = arith.constant 0 : index
    %48 = vector.load %arg4[%c3, %c0_10, %c0_11] : memref<4x8x16xf32, #tpu.memory_space<vmem>>, vector<1x8x16xf32>
    %49 = vector.shape_cast %48 : vector<1x8x16xf32> to vector<8x16xf32>
    %50 = vector.shape_cast %47 : vector<8x16xf32> to vector<1x8x16xf32>
    tpu.vector_store %arg4[%c3, %c0_10, %c0_11], %50 {strides = array<i32>} : memref<4x8x16xf32, #tpu.memory_space<vmem>>, vector<1x8x16xf32>,
    return
  }
  func.func @transform_0(%arg0: i32, %arg1: i32, %arg2: i32, %arg3: memref<8xf32, #tpu.memory_space<smem>>) -> (i32, i32, i32) {
    %c0_i32 = arith.constant 0 : i32
    return %arg0, %arg1, %arg2 : i32, i32, i32
  }
}

</mosaic_0001>

<bundles_post_ra>
// kernel: tpu_custom_call.1
= control target key start
LH: loop header
LB: loop body
LE: loop exit
PB: predicated region body
PF: predicated region fallthrough
CT: control target
= control target key end

     0   :  { %s310_s6 = smov [#allocation3]   ;;  %s408_s0 = inlined_call_operand.hbm [shape: f32[8], index: 0, kind: input, shape index: {}]   ;;  %s409_s1 = inlined_call_operand.hbm [shape: f32[8,8,16], index: 1, kind: output, shape index: {}]  }
   0x1   :  { %7 = dma.hbm_to_smem %s408_s0, 16, %s310_s6, [#allocation2] }
   0x2   :  { %288 = dma.done.wait [#allocation2], 16 }
   0x3   :  { %289 = vsyncadd [#allocation2], 4294967280 }
   0x4   :  { %9 = sfence }
   0x5   :  { %10 = vsyncpa [#allocation5], 0 }
   0x6   :  { %12 = vsyncpa [#allocation5 + $0x1], 0  ;;  %s327_s9 = smov 0   ;;  %s329_s10 = smov 0  }
   0x7   :  { %s331_s11 = smov 0   ;;  %s333_s12 = smov 0  }
   0x8 LB: > { %s33_s0 = sadd.s32 1, %s304_s11  ;;  %s181_s13 = sadd.s32 4294967295, %s308_s12   ;;  %s308_s12 = sphi %s333_s12, %s18_s12   ;;  %s304_s11 = sphi %s331_s11, %s414_s11   ;;  %s300_s10 = sphi %s329_s10, %s413_s10   ;;  %s296_s9 = sphi %s327_s9, %s412_s9  }
   0x9   : > { %p35_p0 = scmp.ge.s32.totalorder %s33_s0, 2  ;;  %p53_p1 = scmp.ne.s32.totalorder %s300_s10, %s296_s9 }
   0xa   : > { %s44_s14 = sadd.s32 1, %s300_s10  ;;  %p54_p2 = scmp.eq.s32.totalorder %s181_s13, 1 }
   0xb   : > { %s416_s0 = smov (%p35_p0, %s33_s0), 0  ;;  %p48_p3 = scmp.eq.s32.totalorder %s308_s12, 1 }
   0xc   : > { %s37_s15 = ssub.s32 %s304_s11, %s416_s0  ;;  %p357_p6 = por %p54_p2, %p53_p1 }
   0xd   : > { %p42_p4 = scmp.eq.s32.totalorder %s37_s15, 0  ;;  %p182_p5 = scmp.ne.s32.totalorder %s37_s15, 0 }
   0xe   : > { %p183_p8 = scmp.ge.s32.totalorder %s308_s12, 2 }
   0xf   : > { %s362_s17 = scalar_select %p42_p4, %s300_s10, %s44_s14  }
  0x10   : > { %p364_p7 = por %p182_p5, %p48_p3  ;;  %63 = sbr.rel (%p183_p8) target bundleno = 44 (0x2c), region = 12 }
  0x11   : > { %s186_s19 = sshll.u32 (!%p183_p8), %s304_s11, 2  ;;  %s68_s20 = sand.u32 (!%p183_p8), 1, %s300_s10  }
  0x12   : > { %s90_s21 = sld [smem:[#allocation3 + %s186_s19]] (!%p183_p8)  ;;  %s95_s22 = sadd.s32 (!%p183_p8), 1, %s186_s19 }
  0x13   : > { %s96_s23 = sld [smem:[#allocation3 + %s95_s22]] (!%p183_p8)  ;;  %s101_s24 = sadd.s32 (!%p183_p8), 2, %s186_s19 }
  0x14   : > { %s107_s25 = sadd.s32 (!%p183_p8), 3, %s186_s19  ;;  %s184_s26 = sshll.u32 (!%p183_p8), %s68_s20, 5 }
  0x15   : > { %v72_v0 = vlaneseq  ;;  %s102_s27 = sld [smem:[#allocation3 + %s101_s24]]  ;;  %s70_s29 = scalar_lea.vmem [#allocation4], %s184_s26  ;;  %vm93_vm0 = vcmask 130048  }
  0x16   : > { %s108_s28 = sld [smem:[#allocation3 + %s107_s25]]  ;;  %s129_s30 = sshll.u32 %s70_s29, 4  ;;  %s374_s30 = int_to_ptr.vmem [resolvable:$true] %s129_s30 }
  0x17   : > { %v73_v1 = vshrl.u32 %v72_v0, 7  ;;  %v78_v2 = vand.u32 127, %v72_v0  ;;  %s195_s2 = sshll.u32 %s304_s11, 9  ;;  %s114_s6 = scalar_lea.sflag [#allocation5], %s68_s20 }
  0x18   : > { %v91_v8 = vstv %s90_s21  ;;  %s379_s5 = scalar_lea.hbm %s409_s1, %s195_s2  ;;  %s246_s7 = scalar_lea.vmem %s374_s30, 512 }
  0x19   : > { %v82_v3 = vadd.s32 8, %v73_v1  ;;  %v97_v9 = vstv %s96_s23  ;;  %p247_p9 = scmp.ne.s32.totalorder %s374_s30, %s246_s7  ;;  %s311_s8 = smov [#allocation4]  }
  0x1a   : > { %s250_s11 = sshll.u32 %s311_s8, 4  ;;  %s251_s11 = int_to_ptr.vmem [resolvable:$false] %s250_s11 }
  0x1b   : > { %v83_v4 = vsub.s32 %v78_v2, %v82_v3  ;;  %v103_v10 = vstv %s102_s27  ;;  %p248_p10 = pnand %p247_p9, %p364_p7  ;;  %s252_s13 = scalar_lea.vmem %s251_s11, 1024 }
  0x1c   : > { %v109_v11 = vstv %s108_s28  ;;  %p253_p12 = scmp.lt.s32.totalorder %s374_s30, %s251_s11  ;;  %p254_p13 = scmp.lt.s32.totalorder %s252_s13, %s246_s7 }
  0x1d   : > { %v85_v5 = vsub.s32 0, %v83_v4  ;;  %p249_p11 = pneg %p248_p10 }
  0x1e   : > { %p255_p0 = por %p254_p13, %p253_p12 }
  0x1f   : > { %v185_v6 = vmin.u32 %v85_v5, %v83_v4 }
  0x20   : > { %p256_p1 = pnand %p255_p0, %p249_p11 }
  0x21   : > { %v87_v7 = vcvt.s32.f32 %v185_v6 }
  0x23   : > { %v88_v12 = vsub.f32 0.0, %v87_v7 }
  0x25   : > { %v92_v13 = vmul.f32 %v91_v8, %v88_v12  ;;  %v98_v14 = vmul.f32 %v97_v9, %v88_v12  ;;  %v104_v15 = vmul.f32 %v103_v10, %v88_v12  ;;  %v110_v16 = vmul.f32 %v109_v11, %v88_v12 }
  0x27   : > { %94 = vst.msk [vmem:[%s70_s29] sm:$0xff] %vm93_vm0, %v92_v13  ;;  %187 = vst.msk [vmem:[%s70_s29 + $0x8] sm:$0xff] %vm93_vm0, %v98_v14 }
  0x28   : > { %188 = vst.msk [vmem:[%s70_s29 + $0x10] sm:$0xff] %vm93_vm0, %v104_v15  ;;  %189 = vst.msk [vmem:[%s70_s29 + $0x18] sm:$0xff] %vm93_vm0, %v110_v16 }
  0x29   : > { %259 = shalt.err (!%p256_p1)
}
  0x2a   : > { %s312_s14 = smov 128   ;;  %s313_s15 = smov 8  }
  0x2b   : > { %196 = dma.vmem_to_hbm [thread:$0]  (%p364_p7), %s374_s30, 512, %s379_s5, %s114_s6, %s312_s14, %s312_s14, %s313_s15  }
  0x2c PF: > { %p202_p2 = scmp.ge.s32.totalorder %s308_s12, 1  ;;  %s144_s19 = sand.u32 1, %s296_s9  }
  0x2d   : > { %s145_s20 = scalar_lea.sflag [#allocation5], %s144_s19 }
  0x2e   : > { %p199_p3 = pnand %p202_p2, %p357_p6 }
  0x30   : > { %p200_p4 = pneg %p199_p3 }
  0x32   : > { %291 = dma.done.wait (%p200_p4), %s145_s20, 512  }
  0x33   : > { %293 = vsyncadd (%p200_p4), %s145_s20, 4294966784  ;;  %s18_s12 = sadd.s32 1, %s308_s12   ;;  %s412_s9 = smov %s300_s10 }
  0x34   : > { %p15_p5 = scmp.ge.s32.totalorder %s18_s12, 3   ;;  %s413_s10 = smov %s362_s17 }
  0x35   : > { %s414_s11 = smov %s416_s0 }
  0x36   :  { %17 = sbr.rel (!%p15_p5) target bundleno = 8 (0x8), region = 47 }
  0x3b   :  { %150 = vsyncpa [#allocation5], 1 }
  0x3c   :  { %152 = vsyncpa [#allocation5 + $0x1], 1 }

</bundles_post_ra>
